<compile_context>
chip_gen: v7x
topology: tpu7x:2x2x1
jax: 0.10.0
libtpu: 0.0.40
codegen_flags: <defaults>
</compile_context>

<pallas_src>
import functools

import jax
import jax.numpy as jnp
from jax import lax
from jax.experimental import pallas as pl
from jax.experimental.pallas import tpu as pltpu

_LANES = 128
_MAX_TILE_ROWS_CARTESIAN = 4096   # 2 MiB per f32 tile, 8 MiB double-buffered
_MAX_TILE_ROWS_MODULUS = 2048     # 1 MiB per f32 tile + headroom for temps
_SPLIT_MIN_ROWS = 64              # below this one full-array block is cheapest
_TARGET_GRID_STEPS = 4            # >= 2 so v7x's two TensorCores both get work
_VMEM_LIMIT_BYTES = 32 * 1024 * 1024


def _act(x):
    # The `activation` passed to ComplexActivation.__init__ — here: ReLU.
    return jnp.maximum(x, 0.0)


# ----------------------------------------------------------------------------
# Kernels (operate on the interleaved f32 slab: even lanes real, odd imag)
# ----------------------------------------------------------------------------
def _cartesian_kernel(x_ref, o_ref):
    # view_as_real -> act -> view_as_complex == act applied independently to
    # real and imag parts; on the interleaved layout that is one elementwise op.
    o_ref[...] = _act(x_ref[...])


def _modulus_kernel(bias_ref, x_ref, o_ref):
    x = x_ref[...]
    bias = bias_ref[0]  # scalar bias (bias_shape=None in the module)

    lane = lax.broadcasted_iota(jnp.int32, x.shape, 1)
    even = (lane % 2) == 0  # even lanes hold real parts, odd lanes imag parts

    # |z|^2 per pair, computed in-lane with two XLU rolls + a parity select:
    #   roll by 127 (== -1): out[l] = in[l+1]  -> even lane 2k gets r^2 + i^2
    #   roll by 1:           out[l] = in[l-1]  -> odd lane copies its pair's sum
    sq_pair = x * x
    pair_sum = sq_pair + pltpu.roll(sq_pair, shift=_LANES - 1, axis=1)
    sq = jnp.where(even, pair_sum, pltpu.roll(pair_sum, shift=1, axis=1))

    # |z| and the unit phasor via a single rsqrt (one EUP op).  torch defines
    # angle(0) == 0, i.e. the phasor at z == 0 is (1, 0), so guard |z| == 0
    # explicitly (rsqrt(0) == inf would otherwise poison the result).
    nonzero = sq > 0.0
    inv = lax.rsqrt(jnp.where(nonzero, sq, 1.0))
    mag = sq * inv                       # == |z| (exactly 0 when z == 0)
    scaled = _act(mag + bias)            # identical on both lanes of a pair
    phasor = jnp.where(nonzero, x * inv, jnp.where(even, 1.0, 0.0))

    o_ref[...] = scaled * phasor         # interleaved (re, im) output


# ----------------------------------------------------------------------------
# Wrapper
# ----------------------------------------------------------------------------
def _round_up(x, m):
    return ((x + m - 1) // m) * m


def _pick_tile_rows(rows, max_tile):
    if rows <= _SPLIT_MIN_ROWS:
        return rows  # single full-array block (always a legal block shape)
    t = _round_up(pl.cdiv(rows, _TARGET_GRID_STEPS), 8)  # sublane-aligned
    return min(max_tile, t)


@functools.partial(jax.jit, static_argnames=("mode",))
def complex_activation(z, bias, mode="cartesian"):
    """JAX/Pallas equivalent of ComplexActivation.forward.

    Args:
      z:    complex64 array, any shape (NCHW in the tests below).
      bias: float32 array of shape (1,) (used only in 'modulus' mode).
      mode: 'cartesian' | 'modulus' | anything else (identity).
    """
    if mode not in ("cartesian", "modulus"):
        return z  # identity branch, no kernel needed

    # TODO(synk): only the default scalar bias (bias_shape=None) is supported;
    # an arbitrary bias_shape would need a second tiled (broadcast) input.

    z = z.astype(jnp.complex64)
    shape = z.shape
    total = 2 * z.size  # number of f32 elements in the interleaved view

    # complex64 -> interleaved f32 (r0, i0, r1, i1, ...).  One fused XLA copy
    # (no complex bitcast available); see header note.
    slab = jnp.stack([jnp.real(z), jnp.imag(z)], axis=-1).reshape(-1)

    padded = pl.cdiv(total, _LANES) * _LANES
    if padded != total:
        # Rare (only when z.size is not a multiple of 64).
        # TODO(synk): handle the short tail with plain jnp to avoid this copy.
        slab = jnp.pad(slab, (0, padded - total))
    rows = padded // _LANES
    slab = slab.reshape(rows, _LANES)

    max_tile = (_MAX_TILE_ROWS_CARTESIAN if mode == "cartesian"
                else _MAX_TILE_ROWS_MODULUS)
    tile_rows = _pick_tile_rows(rows, max_tile)
    grid = (pl.cdiv(rows, tile_rows),)

    vmem_spec = pl.BlockSpec((tile_rows, _LANES), lambda i: (i, 0))
    out_shape = jax.ShapeDtypeStruct((rows, _LANES), jnp.float32)
    cparams = pltpu.CompilerParams(
        dimension_semantics=("parallel",),
        vmem_limit_bytes=_VMEM_LIMIT_BYTES,
    )

    if mode == "cartesian":
        out_slab = pl.pallas_call(
            _cartesian_kernel,
            out_shape=out_shape,
            grid=grid,
            in_specs=[vmem_spec],
            out_specs=vmem_spec,
            compiler_params=cparams,
        )(slab)
    else:  # modulus
        bias_spec = pl.BlockSpec(memory_space=pltpu.MemorySpace.SMEM)
        out_slab = pl.pallas_call(
            _modulus_kernel,
            out_shape=out_shape,
            grid=grid,
            in_specs=[bias_spec, vmem_spec],
            out_specs=vmem_spec,
            compiler_params=cparams,
        )(bias.astype(jnp.float32), slab)

    flat = out_slab.reshape(-1)
    if padded != total:
        flat = flat[:total]
    pair = flat.reshape(*shape, 2)
    return lax.complex(pair[..., 0], pair[..., 1])


# ----------------------------------------------------------------------------
# Pure-JAX reference (mirrors the PyTorch forward)
# ----------------------------------------------------------------------------
def complex_activation_ref(z, bias, mode="cartesian"):
    if mode == "cartesian":
        return lax.complex(_act(jnp.real(z)), _act(jnp.imag(z)))
    elif mode == "modulus":
        zabs = jnp.sqrt(jnp.square(jnp.real(z)) + jnp.square(jnp.imag(z)))
        ang = jnp.angle(z)
        return (_act(zabs + bias[0]) * jnp.exp(1j * ang)).astype(jnp.complex64)
    else:
        return z


if __name__ == "__main__":
    key = jax.random.PRNGKey(0)
    kr, ki = jax.random.split(key)

    # Small NCHW complex input: batch=2, channels=4, spatial=16x16.
    shape = (2, 4, 16, 16)
    zr = jax.random.normal(kr, shape, dtype=jnp.float32)
    zi = jax.random.normal(ki, shape, dtype=jnp.float32)
    z = lax.complex(zr, zi)

    # Deterministic parameter init, matching nn.Parameter(torch.zeros(1)).
    # Use a small nonzero value so the modulus bias path is actually exercised.
    bias = jnp.full((1,), 0.1, dtype=jnp.float32)

    # Also exercise the zero-magnitude corner (angle(0) == 0 convention).
    z = z.at[0, 0, 0, 0].set(0.0 + 0.0j)

    ok = True
    for mode in ("cartesian", "modulus", "identity"):
        out = jax.block_until_ready(complex_activation(z, bias, mode=mode))
        ref = complex_activation_ref(z, bias, mode=mode)
        assert out.shape == z.shape and out.dtype == jnp.complex64
        ok &= bool(
            jnp.allclose(jnp.real(out), jnp.real(ref), atol=1e-5, rtol=1e-4)
            and jnp.allclose(jnp.imag(out), jnp.imag(ref), atol=1e-5, rtol=1e-4)
        )

    assert ok, "Pallas output does not match reference"
    print("KERNEL_OK")
</pallas_src>

<mosaic_0001>
module attributes {stable_mosaic.version = 11 : i64} {
  func.func @_cartesian_kernel(%arg0: i32, %arg1: memref<32x128xf32, #tpu.memory_space<vmem>>, %arg2: memref<32x128xf32, #tpu.memory_space<vmem>>) attributes {dimension_semantics = [#tpu.dimension_semantics<parallel>], iteration_bounds = array<i64: 1>, scalar_prefetch = 0 : i64, scratch_operands = 0 : i64, tpu.core_type = #tpu.core_type<tc>, window_params = [{transform_indices = @transform_0, window_bounds = array<i64: 32, 128>}, {transform_indices = @transform_1, window_bounds = array<i64: 32, 128>}]} {
    %c0 = arith.constant 0 : index
    %c0_0 = arith.constant 0 : index
    %0 = vector.load %arg1[%c0, %c0_0] : memref<32x128xf32, #tpu.memory_space<vmem>>, vector<32x128xf32>
    %cst = arith.constant 0.000000e+00 : f32
    %1 = vector.broadcast %cst : f32 to vector<32x128xf32>
    %2 = arith.maximumf %0, %1 : vector<32x128xf32>
    %c0_1 = arith.constant 0 : index
    %c0_2 = arith.constant 0 : index
    %3 = vector.load %arg2[%c0_1, %c0_2] : memref<32x128xf32, #tpu.memory_space<vmem>>, vector<32x128xf32>
    tpu.vector_store %arg2[%c0_1, %c0_2], %2 {strides = array<i32>} : memref<32x128xf32, #tpu.memory_space<vmem>>, vector<32x128xf32>,
    return
  }
  func.func @transform_0(%arg0: i32) -> (i32, i32) {
    %c0_i32 = arith.constant 0 : i32
    %c0_i32_0 = arith.constant 0 : i32
    return %arg0, %c0_i32 : i32, i32
  }
  func.func @transform_1(%arg0: i32) -> (i32, i32) {
    %c0_i32 = arith.constant 0 : i32
    %c0_i32_0 = arith.constant 0 : i32
    return %arg0, %c0_i32 : i32, i32
  }
}

</mosaic_0001>

<bundles_post_ra>
// kernel: custom-call
= control target key start
LH: loop header
LB: loop body
LE: loop exit
PB: predicated region body
PF: predicated region fallthrough
CT: control target
= control target key end

     0   :  { %2 = vsyncpa [#allocation0], 0  ;;  %s61_s0 = inlined_call_operand.hbm [shape: c64[2,4,16,16], index: 0, kind: input, shape index: {}]   ;;  %s62_s1 = inlined_call_operand.vmem [shape: f32[2,4,16,16], index: 1, kind: output, shape index: {}]  }
   0x1   :  { %s3_s8 = sshll.u32 %s62_s1, 4  ;;  %s9_s11 = scalar_lea.hbm %s61_s0, 2048  ;;  %s4_s8 = int_to_ptr.vmem [resolvable:$true] %s3_s8 }
   0x2   :  { %p10_p0 = scmp.ne.s32.totalorder %s61_s0, %s9_s11  ;;  %s11_s16 = scalar_lea.hbm %s61_s0, 4096 }
   0x3   :  { %p12_p1 = scmp.lt.u32.totalorder %s11_s16, %s9_s11  ;;  %p13_p2 = scmp.lt.u32.totalorder %s9_s11, %s61_s0 }
   0x5   :  { %p14_p3 = por %p13_p2, %p12_p1 }
   0x7   :  { %p15_p4 = pnand %p14_p3, %p10_p0 }
   0x9   :  { %18 = shalt.err (!%p15_p4)  }
   0xa   :  { %s19_s1 = scalar_lea.vmem %s4_s8, 2048  ;;  %p24_p6 = scmp.lt.s32.totalorder %s4_s8, %s4_s8 }
   0xb   :  { %p20_p5 = scmp.ne.s32.totalorder %s4_s8, %s19_s1  ;;  %p25_p7 = scmp.lt.s32.totalorder %s19_s1, %s19_s1 }
   0xd   :  { %p26_p8 = por %p25_p7, %p24_p6 }
   0xf   :  { %p27_p9 = pnand %p26_p8, %p20_p5 }
  0x11   :  { %30 = shalt.err (!%p27_p9)  }
  0x12   :  { %6 = dma.hbm_to_vmem [thread:$0]  %s61_s0, 2048, %s4_s8, [#allocation0] }
  0x13   :  { %31 = dma.done.wait [#allocation0], 2048  }
  0x14   :  { %32 = vsyncadd [#allocation0], 4294965248 }
  0x15   :  { %8 = vsyncpa [#allocation0], 1 }

// kernel: custom-call.1
= control target key start
LH: loop header
LB: loop body
LE: loop exit
PB: predicated region body
PF: predicated region fallthrough
CT: control target
= control target key end

     0   :  { %s59_s0 = inlined_call_operand.hbm [shape: c64[2,4,16,16], index: 0, kind: input, shape index: {}]   ;;  %s60_s1 = inlined_call_operand.vmem [shape: f32[2,4,16,16], index: 1, kind: output, shape index: {}]  }
   0x1   :  { %s2_s8 = scalar_lea.hbm %s59_s0, 2048 }
   0x2   :  { %3 = vsyncpa [#allocation0], 0  ;;  %s4_s11 = sshll.u32 %s60_s1, 4  ;;  %s34_s14 = scalar_lea.hbm %s59_s0, 4096  ;;  %s5_s11 = int_to_ptr.vmem [resolvable:$true] %s4_s11 }
   0x3   :  { %p11_p0 = scmp.ne.s32.totalorder %s2_s8, %s34_s14  ;;  %p13_p1 = scmp.lt.u32.totalorder %s2_s8, %s59_s0 }
   0x4   :  { %p14_p2 = scmp.lt.u32.totalorder %s34_s14, %s34_s14  ;;  %p16_p4 = scmp.lt.u32.totalorder %s34_s14, %s2_s8 }
   0x6   :  { %p15_p3 = por %p14_p2, %p13_p1 }
   0x8   :  { %p17_p5 = por %p16_p4, %p15_p3 }
   0xa   :  { %p18_p6 = pnand %p17_p5, %p11_p0 }
   0xc   :  { %21 = shalt.err (!%p18_p6)  }
   0xd   :  { %s22_s17 = scalar_lea.vmem %s5_s11, 2048  ;;  %p27_p8 = scmp.lt.s32.totalorder %s5_s11, %s5_s11 }
   0xe   :  { %p23_p7 = scmp.ne.s32.totalorder %s5_s11, %s22_s17  ;;  %p28_p9 = scmp.lt.s32.totalorder %s22_s17, %s22_s17 }
  0x10   :  { %p29_p10 = por %p28_p9, %p27_p8 }
  0x12   :  { %p30_p11 = pnand %p29_p10, %p23_p7 }
  0x14   :  { %33 = shalt.err (!%p30_p11)  }
  0x15   :  { %7 = dma.hbm_to_vmem [thread:$0]  %s2_s8, 2048, %s5_s11, [#allocation0] }
  0x16   :  { %35 = dma.done.wait [#allocation0], 2048  }
  0x17   :  { %36 = vsyncadd [#allocation0], 4294965248 }
  0x18   :  { %9 = vsyncpa [#allocation0], 1 }

// kernel: complex_activation.1
= control target key start
LH: loop header
LB: loop body
LE: loop exit
PB: predicated region body
PF: predicated region fallthrough
CT: control target
= control target key end

     0   :  { %s58_s0 = inlined_call_operand.vmem [shape: f32[32,128], index: 0, kind: input, shape index: {}]   ;;  %s59_s1 = inlined_call_operand.vmem [shape: f32[32,128], index: 1, kind: output, shape index: {}]  }
   0x1   :  { %v8_v0 = vld [vmem:[%s58_s0] sm:$0xff]  ;;  %v9_v1 = vld [vmem:[%s58_s0 + $0x8] sm:$0xff]  ;;  %v10_v2 = vld [vmem:[%s58_s0 + $0x10] sm:$0xff] }
   0x2   :  { %v12_v3 = vmax.f32 %v8_v0, 0.0  ;;  %v13_v4 = vmax.f32 %v9_v1, 0.0  ;;  %v14_v5 = vmax.f32 %v10_v2, 0.0  ;;  %v11_v6 = vld [vmem:[%s58_s0 + $0x18] sm:$0xff] }
   0x3   :  { %v15_v7 = vmax.f32 %v11_v6, 0.0 }
   0x4   :  { %16 = vst [vmem:[%s59_s1] sm:$0xff] %v12_v3  ;;  %17 = vst [vmem:[%s59_s1 + $0x8] sm:$0xff] %v13_v4 }
   0x5   :  { %18 = vst [vmem:[%s59_s1 + $0x10] sm:$0xff] %v14_v5  ;;  %19 = vst [vmem:[%s59_s1 + $0x18] sm:$0xff] %v15_v7 }

// kernel: custom-call.2
= control target key start
LH: loop header
LB: loop body
LE: loop exit
PB: predicated region body
PF: predicated region fallthrough
CT: control target
= control target key end

     0   :  { %s126_s0 = inlined_call_operand.vmem [shape: f32[2,4,16,16], index: 0, kind: input, shape index: {}]   ;;  %s127_s1 = inlined_call_operand.vmem [shape: f32[2,4,16,16], index: 1, kind: input, shape index: {}]   ;;  %s128_s2 = inlined_call_operand.hbm [shape: c64[2,4,16,16], index: 2, kind: output, shape index: {}]  }
   0x1   :  { %s87_s11 = scalar_lea.hbm %s128_s2, 2048 }
   0x2   :  { %4 = vsyncpa [#allocation0], 0  ;;  %s5_s14 = sshll.u32 %s126_s0, 4  ;;  %s6_s14 = int_to_ptr.vmem [resolvable:$true] %s5_s14 }
   0x3   :  { %s18_s15 = scalar_lea.vmem %s6_s14, 2048  ;;  %p23_p1 = scmp.lt.s32.totalorder %s6_s14, %s6_s14 }
   0x4   :  { %p19_p0 = scmp.ne.s32.totalorder %s6_s14, %s18_s15  ;;  %p24_p2 = scmp.lt.s32.totalorder %s18_s15, %s18_s15 }
   0x6   :  { %p25_p3 = por %p24_p2, %p23_p1 }
   0x8   :  { %p26_p4 = pnand %p25_p3, %p19_p0 }
   0xa   :  { %29 = shalt.err (!%p26_p4)  }
   0xb   :  { %p31_p5 = scmp.ne.s32.totalorder %s128_s2, %s87_s11  ;;  %s32_s0 = scalar_lea.hbm %s128_s2, 4096 }
   0xc   :  { %p33_p6 = scmp.lt.u32.totalorder %s32_s0, %s87_s11  ;;  %p34_p7 = scmp.lt.u32.totalorder %s87_s11, %s128_s2 }
   0xe   :  { %p35_p8 = por %p34_p7, %p33_p6 }
  0x10   :  { %p36_p9 = pnand %p35_p8, %p31_p5 }
  0x12   :  { %39 = shalt.err (!%p36_p9)  }
  0x13   :  { %8 = dma.vmem_to_hbm [thread:$0]  %s6_s14, 2048, %s128_s2, [#allocation0] }
  0x14   :  { %65 = dma.done.wait [#allocation0], 2048  }
  0x15   :  { %66 = vsyncadd [#allocation0], 4294965248 }
  0x16   :  { %10 = vsyncpa [#allocation0], 1 }
  0x17   :  { %11 = vsyncpa [#allocation1], 0  ;;  %s12_s28 = sshll.u32 %s127_s1, 4  ;;  %s13_s28 = int_to_ptr.vmem [resolvable:$true] %s12_s28 }
  0x18   :  { %s40_s29 = scalar_lea.vmem %s13_s28, 2048  ;;  %p45_p11 = scmp.lt.s32.totalorder %s13_s28, %s13_s28 }
  0x19   :  { %p41_p10 = scmp.ne.s32.totalorder %s13_s28, %s40_s29  ;;  %p46_p12 = scmp.lt.s32.totalorder %s40_s29, %s40_s29 }
  0x1b   :  { %p47_p13 = por %p46_p12, %p45_p11 }
  0x1d   :  { %p48_p0 = pnand %p47_p13, %p41_p10 }
  0x1f   :  { %51 = shalt.err (!%p48_p0)  }
  0x20   :  { %p53_p1 = scmp.ne.s32.totalorder %s87_s11, %s32_s0  ;;  %p56_p2 = scmp.lt.u32.totalorder %s32_s0, %s32_s0 }
  0x22   :  { %p57_p3 = por %p56_p2, %p34_p7 }
  0x24   :  { %p59_p4 = por %p57_p3, %p33_p6 }
  0x26   :  { %p60_p5 = pnand %p59_p4, %p53_p1 }
  0x28   :  { %63 = shalt.err (!%p60_p5)  }
  0x29   :  { %15 = dma.vmem_to_hbm [thread:$0]  %s13_s28, 2048, %s87_s11, [#allocation1] }
  0x2a   :  { %67 = dma.done.wait [#allocation1], 2048  }
  0x2b   :  { %68 = vsyncadd [#allocation1], 4294965248 }
  0x2c   :  { %17 = vsyncpa [#allocation1], 1 }

</bundles_post_ra>
